<compile_context>
chip_gen: v5e
topology: v5e:2x2
jax: 0.10.0
libtpu: 0.0.40
codegen_flags: <defaults>
</compile_context>

<pallas_src>
import functools

import jax
import jax.numpy as jnp
from jax import lax
from jax.experimental import pallas as pl
from jax.experimental.pallas import tpu as pltpu

IN_DIM = 6
H1_DIM = 64
H2_DIM = 32
OUT_DIM = 3

IN_PAD = 8    # 6 -> 8  (sublane multiple)
OUT_PAD = 8   # 3 -> 8  (sublane multiple)
LANE = 128


def _round_up(x, m):
    return ((x + m - 1) // m) * m


def _mlp_kernel(x_ref, w1_ref, b1_ref, w2_ref, b2_ref, w3_ref, b3_ref, o_ref,
                *, sub):
    """Batch-on-lanes fused MLP.

    x_ref: (IN_PAD, TB) f32, weights bf16 (out, in), biases f32 (out, 1),
    o_ref: (OUT_PAD, TB) f32.  Processes the tile in `sub`-lane sub-blocks so
    the h1/h2 intermediates never touch VMEM.
    """
    tb = x_ref.shape[1]
    n_sub = tb // sub

    # Hoisted once per grid step: tiny, VMEM-resident constants.
    w1 = w1_ref[...]          # (64, 8)  bf16
    b1 = b1_ref[...]          # (64, 1)  f32
    w2 = w2_ref[...]          # (32, 64) bf16
    b2 = b2_ref[...]          # (32, 1)  f32
    w3 = w3_ref[...]          # (8, 32)  bf16
    b3 = b3_ref[...]          # (8, 1)   f32

    def body(s, carry):
        off = pl.multiple_of(s * sub, sub)
        xb = x_ref[:, pl.ds(off, sub)].astype(jnp.bfloat16)              # (8, sub)
        h1 = jnp.dot(w1, xb, preferred_element_type=jnp.float32)         # (64, sub)
        h1 = jnp.maximum(h1 + b1, 0.0)                                   # f32 VPU
        h2 = jnp.dot(w2, h1.astype(jnp.bfloat16),
                     preferred_element_type=jnp.float32)                 # (32, sub)
        h2 = jnp.maximum(h2 + b2, 0.0)
        out = jnp.dot(w3, h2.astype(jnp.bfloat16),
                      preferred_element_type=jnp.float32)                # (8, sub)
        o_ref[:, pl.ds(off, sub)] = (out + b3).astype(o_ref.dtype)
        return carry

    lax.fori_loop(0, n_sub, body, 0, unroll=True)


def wavelet_weight_forward(x, params, *, batch_tile=8192):
    """x: (B, 6) float32. params: PyTorch-layout weights (out, in), biases (out,).
    Returns (B, 3) float32 (bf16 matmul operands, f32 accumulation)."""
    B, F = x.shape
    assert F == IN_DIM

    w1, b1 = params["w1"], params["b1"]   # (64, 6),  (64,)
    w2, b2 = params["w2"], params["b2"]   # (32, 64), (32,)
    w3, b3 = params["w3"], params["b3"]   # (3, 32),  (3,)

    # Lane tile: multiple of 128, no bigger than the (padded) batch.
    b_lane = _round_up(B, LANE)
    tb = min(_round_up(batch_tile, LANE), b_lane)
    # v7x megacore: keep >= 2 grid steps when the batch allows it so both
    # TensorCores get work (no-op for small batches; harmless on v5e/v6e).
    if b_lane >= 2 * LANE and b_lane // tb < 2:
        tb = max(LANE, _round_up(b_lane // 2, LANE))
    b_pad = _round_up(B, tb)
    grid = (b_pad // tb,)

    # Inner sub-block width: largest of 512/256/128 that divides the tile.
    if tb % 512 == 0:
        sub = 512
    elif tb % 256 == 0:
        sub = 256
    else:
        sub = 128

    f32 = jnp.float32
    bf16 = jnp.bfloat16

    # Batch on lanes: (IN_PAD, b_pad), zero-padded feature rows and batch cols.
    x_t = jnp.zeros((IN_PAD, b_pad), f32).at[:IN_DIM, :B].set(x.T.astype(f32))

    # One-time host-side packing: weights padded (out, in) and cast to bf16,
    # biases kept f32 as (out, 1) lane-broadcast columns.
    w1p = jnp.zeros((H1_DIM, IN_PAD), f32).at[:, :IN_DIM].set(w1.astype(f32)).astype(bf16)
    b1p = b1.reshape(H1_DIM, 1).astype(f32)
    w2p = w2.astype(bf16)
    b2p = b2.reshape(H2_DIM, 1).astype(f32)
    w3p = jnp.zeros((OUT_PAD, H2_DIM), f32).at[:OUT_DIM, :].set(w3.astype(f32)).astype(bf16)
    b3p = jnp.zeros((OUT_PAD, 1), f32).at[:OUT_DIM, 0].set(b3.astype(f32))

    in_specs = [
        pl.BlockSpec((IN_PAD, tb), lambda i: (0, i)),       # x tile (batch on lanes)
        pl.BlockSpec((H1_DIM, IN_PAD), lambda i: (0, 0)),   # w1 (resident across grid)
        pl.BlockSpec((H1_DIM, 1), lambda i: (0, 0)),        # b1
        pl.BlockSpec((H2_DIM, H1_DIM), lambda i: (0, 0)),   # w2
        pl.BlockSpec((H2_DIM, 1), lambda i: (0, 0)),        # b2
        pl.BlockSpec((OUT_PAD, H2_DIM), lambda i: (0, 0)),  # w3
        pl.BlockSpec((OUT_PAD, 1), lambda i: (0, 0)),       # b3
    ]
    out_spec = pl.BlockSpec((OUT_PAD, tb), lambda i: (0, i))  # lane-dense output slab

    flops = 2 * b_pad * (IN_PAD * H1_DIM + H1_DIM * H2_DIM + H2_DIM * OUT_PAD)
    weight_bytes = (
        int(w1p.size + w2p.size + w3p.size) * 2
        + int(b1p.size + b2p.size + b3p.size) * 4
    )
    bytes_accessed = int(x_t.size) * 4 + OUT_PAD * b_pad * 4 + weight_bytes
    cost = pl.CostEstimate(flops=flops, transcendentals=0,
                           bytes_accessed=bytes_accessed)

    kernel = functools.partial(_mlp_kernel, sub=sub)

    out_padded = pl.pallas_call(
        kernel,
        out_shape=jax.ShapeDtypeStruct((OUT_PAD, b_pad), f32),
        grid_spec=pltpu.PrefetchScalarGridSpec(
            num_scalar_prefetch=0,
            grid=grid,
            in_specs=in_specs,
            out_specs=out_spec,
        ),
        compiler_params=pltpu.CompilerParams(
            dimension_semantics=("parallel",),       # megacore sharding on v7x
            vmem_limit_bytes=32 * 1024 * 1024,
        ),
        cost_estimate=cost,
    )(x_t, w1p, b1p, w2p, b2p, w3p, b3p)

    # Drop the feature/batch padding and return to (B, 3).
    return out_padded[:OUT_DIM, :B].T


def init_params(key):
    """Deterministic init matching nn.Linear's default U(-1/sqrt(fan_in), ...),
    stored in PyTorch layout: weight (out, in), bias (out,)."""
    def linear_init(k, fan_in, fan_out):
        kw, kb = jax.random.split(k)
        bound = 1.0 / jnp.sqrt(float(fan_in))
        w = jax.random.uniform(kw, (fan_out, fan_in), jnp.float32, -bound, bound)
        b = jax.random.uniform(kb, (fan_out,), jnp.float32, -bound, bound)
        return w, b

    k1, k2, k3 = jax.random.split(key, 3)
    w1, b1 = linear_init(k1, IN_DIM, H1_DIM)
    w2, b2 = linear_init(k2, H1_DIM, H2_DIM)
    w3, b3 = linear_init(k3, H2_DIM, OUT_DIM)
    return dict(w1=w1, b1=b1, w2=w2, b2=b2, w3=w3, b3=b3)


def reference_forward(x, params):
    h1 = jnp.maximum(x @ params["w1"].T + params["b1"], 0.0)
    h2 = jnp.maximum(h1 @ params["w2"].T + params["b2"], 0.0)
    return h2 @ params["w3"].T + params["b3"]


if __name__ == "__main__":
    key = jax.random.PRNGKey(0)
    k_params, k_x = jax.random.split(key)

    params = init_params(k_params)

    batch = 16  # small, deliberately NOT a multiple of 128 (exercises ragged padding)
    x = jax.random.normal(k_x, (batch, IN_DIM), jnp.float32)

    out = wavelet_weight_forward(x, params)
    out = jax.block_until_ready(out)

    ref = reference_forward(x, params)
    assert out.shape == (batch, OUT_DIM)
    # bf16 matmul operands with f32 accumulation -> loosened (but meaningful) tolerance.
    assert jnp.allclose(out, ref, atol=5e-2, rtol=5e-2), "mismatch vs reference"

    print("KERNEL_OK")
</pallas_src>

<mosaic_0001>
module attributes {stable_mosaic.version = 11 : i64} {
  func.func @_mlp_kernel(%arg0: i32, %arg1: memref<8x128xf32, #tpu.memory_space<vmem>>, %arg2: memref<64x8xbf16, #tpu.memory_space<vmem>>, %arg3: memref<64x1xf32, #tpu.memory_space<vmem>>, %arg4: memref<32x64xbf16, #tpu.memory_space<vmem>>, %arg5: memref<32x1xf32, #tpu.memory_space<vmem>>, %arg6: memref<8x32xbf16, #tpu.memory_space<vmem>>, %arg7: memref<8x1xf32, #tpu.memory_space<vmem>>, %arg8: memref<8x128xf32, #tpu.memory_space<vmem>>) attributes {dimension_semantics = [#tpu.dimension_semantics<parallel>], iteration_bounds = array<i64: 1>, scalar_prefetch = 0 : i64, scratch_operands = 0 : i64, tpu.core_type = #tpu.core_type<tc>, window_params = [{transform_indices = @transform_0, window_bounds = array<i64: 8, 128>}, {pipeline_mode = #tpu.pipeline_mode<synchronous>, transform_indices = @transform_1, window_bounds = array<i64: 64, 8>}, {pipeline_mode = #tpu.pipeline_mode<synchronous>, transform_indices = @transform_2, window_bounds = array<i64: 64, 1>}, {pipeline_mode = #tpu.pipeline_mode<synchronous>, transform_indices = @transform_3, window_bounds = array<i64: 32, 64>}, {pipeline_mode = #tpu.pipeline_mode<synchronous>, transform_indices = @transform_4, window_bounds = array<i64: 32, 1>}, {pipeline_mode = #tpu.pipeline_mode<synchronous>, transform_indices = @transform_5, window_bounds = array<i64: 8, 32>}, {pipeline_mode = #tpu.pipeline_mode<synchronous>, transform_indices = @transform_6, window_bounds = array<i64: 8, 1>}, {transform_indices = @transform_7, window_bounds = array<i64: 8, 128>}]} {
    %c0 = arith.constant 0 : index
    %c0_0 = arith.constant 0 : index
    %0 = vector.load %arg2[%c0, %c0_0] : memref<64x8xbf16, #tpu.memory_space<vmem>>, vector<64x8xbf16>
    %c0_1 = arith.constant 0 : index
    %c0_2 = arith.constant 0 : index
    %1 = vector.load %arg3[%c0_1, %c0_2] : memref<64x1xf32, #tpu.memory_space<vmem>>, vector<64x1xf32>
    %c0_3 = arith.constant 0 : index
    %c0_4 = arith.constant 0 : index
    %2 = vector.load %arg4[%c0_3, %c0_4] : memref<32x64xbf16, #tpu.memory_space<vmem>>, vector<32x64xbf16>
    %c0_5 = arith.constant 0 : index
    %c0_6 = arith.constant 0 : index
    %3 = vector.load %arg5[%c0_5, %c0_6] : memref<32x1xf32, #tpu.memory_space<vmem>>, vector<32x1xf32>
    %c0_7 = arith.constant 0 : index
    %c0_8 = arith.constant 0 : index
    %4 = vector.load %arg6[%c0_7, %c0_8] : memref<8x32xbf16, #tpu.memory_space<vmem>>, vector<8x32xbf16>
    %c0_9 = arith.constant 0 : index
    %c0_10 = arith.constant 0 : index
    %5 = vector.load %arg7[%c0_9, %c0_10] : memref<8x1xf32, #tpu.memory_space<vmem>>, vector<8x1xf32>
    %c0_i32 = arith.constant 0 : i32
    %c128_i32 = arith.constant 128 : i32
    %6 = arith.muli %c0_i32, %c128_i32 : i32
    %7 = tpu.assume_multiple %6, 128 : i32
    %c0_11 = arith.constant 0 : index
    %8 = arith.index_cast %7 : i32 to index
    %9 = vector.load %arg1[%c0_11, %8] : memref<8x128xf32, #tpu.memory_space<vmem>>, vector<8x128xf32>
    %10 = arith.truncf %9 : vector<8x128xf32> to vector<8x128xbf16>
    %cst = arith.constant dense<0.000000e+00> : vector<64x128xf32>
    %11 = tpu.matmul %0, %10, %cst {dimension_numbers = #tpu.dot_dimension_numbers<[1], [0], [0], [1], [0, 0, 1, 1], [], []>} : vector<64x8xbf16>, vector<8x128xbf16>, vector<64x128xf32> -> vector<64x128xf32>
    %12 = vector.broadcast %1 : vector<64x1xf32> to vector<64x128xf32>
    %13 = arith.addf %11, %12 : vector<64x128xf32>
    %cst_12 = arith.constant 0.000000e+00 : f32
    %14 = vector.broadcast %cst_12 : f32 to vector<64x128xf32>
    %15 = arith.maximumf %13, %14 : vector<64x128xf32>
    %16 = arith.truncf %15 : vector<64x128xf32> to vector<64x128xbf16>
    %cst_13 = arith.constant dense<0.000000e+00> : vector<32x128xf32>
    %17 = tpu.matmul %2, %16, %cst_13 {dimension_numbers = #tpu.dot_dimension_numbers<[1], [0], [0], [1], [0, 0, 1, 1], [], []>} : vector<32x64xbf16>, vector<64x128xbf16>, vector<32x128xf32> -> vector<32x128xf32>
    %18 = vector.broadcast %3 : vector<32x1xf32> to vector<32x128xf32>
    %19 = arith.addf %17, %18 : vector<32x128xf32>
    %cst_14 = arith.constant 0.000000e+00 : f32
    %20 = vector.broadcast %cst_14 : f32 to vector<32x128xf32>
    %21 = arith.maximumf %19, %20 : vector<32x128xf32>
    %22 = arith.truncf %21 : vector<32x128xf32> to vector<32x128xbf16>
    %cst_15 = arith.constant dense<0.000000e+00> : vector<8x128xf32>
    %23 = tpu.matmul %4, %22, %cst_15 {dimension_numbers = #tpu.dot_dimension_numbers<[1], [0], [0], [1], [0, 0, 1, 1], [], []>} : vector<8x32xbf16>, vector<32x128xbf16>, vector<8x128xf32> -> vector<8x128xf32>
    %24 = vector.broadcast %5 : vector<8x1xf32> to vector<8x128xf32>
    %25 = arith.addf %23, %24 : vector<8x128xf32>
    %c0_16 = arith.constant 0 : index
    %26 = arith.index_cast %7 : i32 to index
    %27 = vector.load %arg8[%c0_16, %26] : memref<8x128xf32, #tpu.memory_space<vmem>>, vector<8x128xf32>
    tpu.vector_store %arg8[%c0_16, %26], %25 {strides = array<i32>} : memref<8x128xf32, #tpu.memory_space<vmem>>, vector<8x128xf32>,
    %c1_i32 = arith.constant 1 : i32
    return
  }
  func.func @transform_0(%arg0: i32) -> (i32, i32) {
    %c0_i32 = arith.constant 0 : i32
    %c0_i32_0 = arith.constant 0 : i32
    return %c0_i32, %arg0 : i32, i32
  }
  func.func @transform_1(%arg0: i32) -> (i32, i32) {
    %c0_i32 = arith.constant 0 : i32
    %c0_i32_0 = arith.constant 0 : i32
    %c0_i32_1 = arith.constant 0 : i32
    return %c0_i32, %c0_i32_0 : i32, i32
  }
  func.func @transform_2(%arg0: i32) -> (i32, i32) {
    %c0_i32 = arith.constant 0 : i32
    %c0_i32_0 = arith.constant 0 : i32
    %c0_i32_1 = arith.constant 0 : i32
    return %c0_i32, %c0_i32_0 : i32, i32
  }
  func.func @transform_3(%arg0: i32) -> (i32, i32) {
    %c0_i32 = arith.constant 0 : i32
    %c0_i32_0 = arith.constant 0 : i32
    %c0_i32_1 = arith.constant 0 : i32
    return %c0_i32, %c0_i32_0 : i32, i32
  }
  func.func @transform_4(%arg0: i32) -> (i32, i32) {
    %c0_i32 = arith.constant 0 : i32
    %c0_i32_0 = arith.constant 0 : i32
    %c0_i32_1 = arith.constant 0 : i32
    return %c0_i32, %c0_i32_0 : i32, i32
  }
  func.func @transform_5(%arg0: i32) -> (i32, i32) {
    %c0_i32 = arith.constant 0 : i32
    %c0_i32_0 = arith.constant 0 : i32
    %c0_i32_1 = arith.constant 0 : i32
    return %c0_i32, %c0_i32_0 : i32, i32
  }
  func.func @transform_6(%arg0: i32) -> (i32, i32) {
    %c0_i32 = arith.constant 0 : i32
    %c0_i32_0 = arith.constant 0 : i32
    %c0_i32_1 = arith.constant 0 : i32
    return %c0_i32, %c0_i32_0 : i32, i32
  }
  func.func @transform_7(%arg0: i32) -> (i32, i32) {
    %c0_i32 = arith.constant 0 : i32
    %c0_i32_0 = arith.constant 0 : i32
    return %c0_i32, %arg0 : i32, i32
  }
}

</mosaic_0001>

<bundles_post_ra>
// kernel: tpu_custom_call.1
= control target key start
LH: loop header
LB: loop body
LE: loop exit
PB: predicated region body
PF: predicated region fallthrough
CT: control target
= control target key end

     0   :  { %vm129_vm0 = vcmask 1043456   ;;  %v344_v3 = vmov 0   ;;  %vm116_vm1 = vcmask 64512   ;;  %s456_s0 = inlined_call_operand.vmem [shape: f32[8,128], index: 0, kind: input, shape index: {}]   ;;  %s457_s1 = inlined_call_operand.vmem [shape: bf16[64,8], index: 1, kind: input, shape index: {}]   ;;  %s458_s2 = inlined_call_operand.vmem [shape: f32[64,1], index: 2, kind: input, shape index: {}]   ;;  %s459_s3 = inlined_call_operand.vmem [shape: bf16[32,64], index: 3, kind: input, shape index: {}]   ;;  %s460_s4 = inlined_call_operand.vmem [shape: f32[32,1], index: 4, kind: input, shape index: {}]   ;;  %s461_s5 = inlined_call_operand.vmem [shape: bf16[8,32], index: 5, kind: input, shape index: {}]   ;;  %s462_s6 = inlined_call_operand.vmem [shape: f32[8,1], index: 6, kind: input, shape index: {}]   ;;  %s463_s7 = inlined_call_operand.hbm [shape: f32[8,128], index: 7, kind: output, shape index: {}]  }
   0x1   :  { %v54_v0 = vld [vmem:[%s456_s0] sm:$0xff]  ;;  %v42_v1 = vld [vmem:[%s458_s2 + $0x30] sm:$0xff]  ;;  %315 = vset.pattern.permute.xlu0 %v344_v3  ;;  %316 = vset.pattern.permute.xlu1 %v344_v3 }
   0x2   :  { %v55_v2 = vpack.c.bf16 %v54_v0, %v54_v0  ;;  %v40_v4 = vld [vmem:[%s458_s2 + $0x20] sm:$0xff]  ;;  %88 = vperm.xlu0 %315, %v42_v1   ;;  %v308_v6 = vld [vmem:[%s457_s1 + $0x10] sm:$0xff]  ;;  %317 = vset.pattern.permute.xlu2 %v344_v3 }
   0x3   :  { %78 = vperm.xlu1 %316, %v40_v4   ;;  %v306_v7 = vld [vmem:[%s457_s1] sm:$0xff]  ;;  %v38_v8 = vld [vmem:[%s458_s2 + $0x10] sm:$0xff] }
   0x4   :  { %v131_v5 = vsel %vm129_vm0, %v55_v2, 0  ;;  %68 = vperm.xlu2 %317, %v38_v8  }
   0x5   :  { %312 = vmatpush.bf16.msra.mxu3 %v131_v5  ;;  %140 = vmatpush.bf16.msra.mxu0 %v131_v5 }
   0x6   :  { %12 = vsyncpa [#allocation3], 0  ;;  %v43_v9 = vld [vmem:[%s458_s2 + $0x38] sm:$0xff]  ;;  %v41_v10 = vld [vmem:[%s458_s2 + $0x28] sm:$0xff]  ;;  %vm204_vm2 = vcmask 523264   ;;  %vm241_vm3 = vcmask 261120  }
   0x7   :  { %v39_v11 = vld [vmem:[%s458_s2 + $0x18] sm:$0xff]  ;;  %v36_v12 = vld [vmem:[%s458_s2] sm:$0xff]  ;;  %v37_v13 = vld [vmem:[%s458_s2 + $0x8] sm:$0xff]  ;;  %s345_s13 = smov [#allocation2]   ;;  %s266_s17 = sshll.u32 %s463_s7, 4  ;;  %s267_s17 = int_to_ptr.hbm [resolvable:$true] %s266_s17 }
   0x8   :  { %293 = vmatmul.msk.bf16.vlgmr.msra.gmra.mxu3 %vm116_vm1, %v308_v6  ;;  %291 = vmatmul.msk.bf16.vlgmr.msra.gmra.mxu0 %vm116_vm1, %v306_v7  ;;  %v50_v14 = vld [vmem:[%s460_s4 + $0x10] sm:$0xff]  ;;  %v309_v15 = vld [vmem:[%s457_s1 + $0x18] sm:$0xff]  ;;  %v307_v16 = vld [vmem:[%s457_s1 + $0x8] sm:$0xff]  ;;  %s264_s14 = sshll.u32 %s345_s13, 4  ;;  %s265_s14 = int_to_ptr.vmem [resolvable:$true] %s264_s14 }
   0x9   :  { %v51_v17 = vld [vmem:[%s460_s4 + $0x18] sm:$0xff]  ;;  %v48_v18 = vld [vmem:[%s460_s4] sm:$0xff]  ;;  %v49_v19 = vld [vmem:[%s460_s4 + $0x8] sm:$0xff] }
   0xa   :  { %93 = vperm.xlu0 %315, %v43_v9   ;;  %v53_v20 = vld [vmem:[%s462_s6] sm:$0xff]  ;;  %v311_v58 = vld [vmem:[%s459_s3 + $0x8] sm:$0xff] }
   0xb   :  { %83 = vperm.xlu1 %316, %v41_v10   ;;  %v310_v57 = vld [vmem:[%s459_s3] sm:$0xff] }
   0xc   :  { %73 = vperm.xlu2 %317, %v39_v11  }
  0x12   :  { %58 = vperm.xlu0 %315, %v36_v12  }
  0x13   :  { %63 = vperm.xlu1 %316, %v37_v13   ;;  %v52_v13 = vld [vmem:[%s461_s5] sm:$0xf] }
  0x14   :  { %186 = vperm.xlu2 %317, %v50_v14  }
  0x18   :  { %294 = vmatmul.msk.bf16.gmra.mxu3 %vm116_vm1, %v309_v15  ;;  %292 = vmatmul.msk.bf16.gmra.mxu0 %vm116_vm1, %v307_v16 }
  0x1a   :  { %191 = vperm.xlu0 %315, %v51_v17  }
  0x1b   :  { %176 = vperm.xlu1 %316, %v48_v18  }
  0x1c   :  { %181 = vperm.xlu2 %317, %v49_v19  }
  0x22   :  { %238 = vperm.xlu0 %315, %v53_v20  }
  0x5e   :  { %v69_v29 = vpop.permute.xlu2 %68 }
  0x66   :  { %v74_v40 = vpop.permute.xlu2 %73 }
  0x6e   :  { %v187_v61 = vpop.permute.xlu2 %186 }
  0x74   :  { %v89_v26 = vpop.permute.xlu0 %88 }
  0x75   :  { %v79_v25 = vpop.permute.xlu1 %78 }
  0x76   :  { %v182_v63 = vpop.permute.xlu2 %181 }
  0x7c   :  { %v94_v31 = vpop.permute.xlu0 %93 }
  0x7d   :  { %v84_v30 = vpop.permute.xlu1 %83 }
  0x84   :  { %v59_v46 = vpop.permute.xlu0 %58 }
  0x85   :  { %v142_v21 = vpop.f32.mrf.mxu0  ;;  %v64_v45 = vpop.permute.xlu1 %63 }
  0x86   :  { %v143_v48 = vadd.f32 %v142_v21, %v59_v46 }
  0x88   :  { %v162_v53 = vmax.f32 %v143_v48, 0.0 }
  0x8b   :  { %v152_v22 = vpop.f32.mrf.mxu3 }
  0x8c   :  { %v153_v37 = vadd.f32 %v152_v22, %v79_v25  ;;  %v192_v1 = vpop.permute.xlu0 %191 }
  0x8d   :  { %v144_v23 = vpop.f32.mrf.mxu0  ;;  %v177_v5 = vpop.permute.xlu1 %176 }
  0x8e   :  { %v166_v47 = vmax.f32 %v153_v37, 0.0  ;;  %v145_v49 = vadd.f32 %v144_v23, %v64_v45 }
  0x90   :  { %v163_v54 = vmax.f32 %v145_v49, 0.0 }
  0x92   :  { %v170_v56 = vpack.c.bf16 %v163_v54, %v162_v53 }
  0x93   :  { %v154_v24 = vpop.f32.mrf.mxu3 }
  0x94   :  { %v155_v34 = vadd.f32 %v154_v24, %v84_v30  ;;  %v239_v14 = vpop.permute.xlu0 %238 }
  0x95   :  { %v147_v27 = vpop.f32.mrf.mxu0 }
  0x96   :  { %v167_v41 = vmax.f32 %v155_v34, 0.0  ;;  %v148_v42 = vadd.f32 %v147_v27, %v69_v29 }
  0x98   :  { %v164_v50 = vmax.f32 %v148_v42, 0.0  ;;  %v172_v52 = vpack.c.bf16 %v167_v41, %v166_v47 }
  0x9b   :  { %v157_v28 = vpop.f32.mrf.mxu3 }
  0x9c   :  { %v158_v32 = vadd.f32 %v157_v28, %v89_v26 }
  0x9d   :  { %v149_v36 = vpop.f32.mrf.mxu0 }
  0x9e   :  { %v168_v38 = vmax.f32 %v158_v32, 0.0  ;;  %v150_v43 = vadd.f32 %v149_v36, %v74_v40 }
  0xa0   :  { %v165_v51 = vmax.f32 %v150_v43, 0.0 }
  0xa2   :  { %v171_v55 = vpack.c.bf16 %v165_v51, %v164_v50 }
  0xa3   :  { %v159_v33 = vpop.f32.mrf.mxu3 }
  0xa4   :  { %v160_v35 = vadd.f32 %v159_v33, %v94_v31 }
  0xa6   :  { %v169_v39 = vmax.f32 %v160_v35, 0.0 }
  0xa8   :  { %v173_v44 = vpack.c.bf16 %v169_v39, %v168_v38 }
  0xaa   :  { %215 = vmatpush.bf16.msra.mxu1 %v173_v44 }
  0xae   :  { %216 = vmatpush.bf16.msra.mxu1 %v172_v52 }
  0xb2   :  { %217 = vmatpush.bf16.msra.mxu1 %v171_v55 }
  0xb6   :  { %218 = vmatpush.bf16.msra.mxu1 %v170_v56 }
  0xb9   :  { %303 = vmatmul.msk.bf16.vlgmr.msra.gmra.mxu1 %vm204_vm2, %v310_v57 }
  0xc9   :  { %304 = vmatmul.msk.bf16.gmra.mxu1 %vm204_vm2, %v311_v58 }
 0x136   :  { %v220_v59 = vpop.f32.mrf.mxu1 }
 0x137   :  { %v221_v6 = vadd.f32 %v220_v59, %v177_v5 }
 0x139   :  { %v230_v11 = vmax.f32 %v221_v6, 0.0 }
 0x13e   :  { %v222_v60 = vpop.f32.mrf.mxu1 }
 0x13f   :  { %v223_v3 = vadd.f32 %v222_v60, %v182_v63 }
 0x141   :  { %v231_v9 = vmax.f32 %v223_v3, 0.0 }
 0x143   :  { %v234_v12 = vpack.c.bf16 %v231_v9, %v230_v11 }
 0x146   :  { %v225_v62 = vpop.f32.mrf.mxu1 }
 0x147   :  { %v226_v0 = vadd.f32 %v225_v62, %v187_v61 }
 0x149   :  { %v232_v7 = vmax.f32 %v226_v0, 0.0 }
 0x14e   :  { %v227_v2 = vpop.f32.mrf.mxu1 }
 0x14f   :  { %v228_v4 = vadd.f32 %v227_v2, %v192_v1 }
 0x151   :  { %v233_v8 = vmax.f32 %v228_v4, 0.0 }
 0x153   :  { %v235_v10 = vpack.c.bf16 %v233_v8, %v232_v7 }
 0x155   :  { %251 = vmatpush.bf16.msra.mxu2 %v235_v10 }
 0x159   :  { %252 = vmatpush.bf16.msra.mxu2 %v234_v12 }
 0x15c   :  { %305 = vmatmul.msk.bf16.vlgmr.msra.gmra.mxu2 %vm241_vm3, %v52_v13 }
 0x1df   :  { %v254_v15 = vpop.f32.mrf.mxu2 }
 0x1e0   :  { %v255_v16 = vadd.f32 %v254_v15, %v239_v14 }
 0x1e2   :  { %258 = vst [vmem:[#allocation2] sm:$0xff] %v255_v16 }
 0x1e3   :  { %269 = dma.vmem_to_hbm [thread:$0]  %s265_s14, 128, %s267_s17, [#allocation3]  }
 0x1e7   :  { %v256_v17 = vpop.f32.mrf.mxu2 }
 0x1e8   :  { %342 = dma.done.wait [#allocation3], 128  }
 0x1e9   :  { %343 = vsyncadd [#allocation3], 4294967168 }
 0x1ea   :  { %274 = vsyncpa [#allocation3], 1 }

</bundles_post_ra>
